<compile_context>
chip_gen: v5e
topology: v5e:2x2
jax: 0.10.0
libtpu: 0.0.40
codegen_flags: <defaults>
</compile_context>

<pallas_src>
import functools

import jax
import jax.numpy as jnp
from jax.experimental import pallas as pl
from jax.experimental.pallas import tpu as pltpu


PATCH = 4
C_OUT = 96
LN_EPS = 1e-5
MAX_TILE_M = 2048  # rows per grid step; double-buffered blocks stay well under
                   # every generation's scoped-VMEM default (v5e 16 MiB incl.)


def _swin_embed_kernel(p_ref, w_ref, s_ref, o_ref):
    # p_ref: (TM, K)  patch-flattened pixels
    # w_ref: (K, C)   conv weight reshaped to a matmul weight (resident)
    # s_ref: (3, C)   rows = [conv bias, ln gamma, ln beta] (resident)
    # o_ref: (TM, C)
    x = jnp.dot(p_ref[...], w_ref[...], preferred_element_type=jnp.float32)
    x = x + s_ref[0:1, :]                                   # conv bias

    # LayerNorm over the channel (last) dim
    mean = jnp.mean(x, axis=-1, keepdims=True)
    centered = x - mean
    var = jnp.mean(centered * centered, axis=-1, keepdims=True)
    y = centered * jax.lax.rsqrt(var + LN_EPS)
    y = y * s_ref[1:2, :] + s_ref[2:3, :]

    # ReLU
    o_ref[...] = jnp.maximum(y, 0.0).astype(o_ref.dtype)


def _choose_tile_m(n, max_tile=MAX_TILE_M):
    """Largest divisor of n that is a multiple of 8 and <= max_tile.

    Prefers tiles that leave >= 2 grid steps (so the 'parallel' grid axis can
    be split across both v7x TensorCores). Falls back to a single full block
    (block dim == array dim is always a legal BlockSpec) for tiny/odd N.
    """
    divs = [d for d in range(8, min(n, max_tile) + 1, 8) if n % d == 0]
    multi_step = [d for d in divs if n // d >= 2]
    if multi_step:
        return max(multi_step)
    if divs:
        return max(divs)
    return n


@functools.partial(jax.jit, static_argnames=("tile_m",))
def swin_embedding(x, conv_w, conv_b, ln_gamma, ln_beta, *, tile_m=None):
    """x: (B, 3, H, W) float32 (NCHW, like PyTorch). Returns (B, (H/4)*(W/4), C)."""
    B, Cin, H, W = x.shape
    assert Cin == 3 and H % PATCH == 0 and W % PATCH == 0
    Hp, Wp = H // PATCH, W // PATCH
    N = B * Hp * Wp
    K = Cin * PATCH * PATCH

    # --- glue: patch extraction (feature order (c, kh, kw) == conv weight) ---
    # TODO(synk): this transpose is a separate XLA pass over the input in HBM;
    # fusing it into the kernel needs in-VMEM lane<->sublane relayouts that are
    # deliberately left out to keep the kernel guaranteed-lowerable.
    patches = x.reshape(B, Cin, Hp, PATCH, Wp, PATCH)
    patches = patches.transpose(0, 2, 4, 1, 3, 5)          # (B, Hp, Wp, c, kh, kw)
    patches = patches.reshape(N, K)                        # rows ordered (b, ph, pw)

    # conv weight (C, 3, 4, 4) -> matmul weight (K, C); params -> one (3, C) block
    w_mat = conv_w.reshape(C_OUT, K).T
    params = jnp.stack([conv_b, ln_gamma, ln_beta], axis=0)  # (3, C)

    if tile_m is None:
        tile_m = _choose_tile_m(N)
    assert N % tile_m == 0
    grid = (N // tile_m,)

    out = pl.pallas_call(
        _swin_embed_kernel,
        out_shape=jax.ShapeDtypeStruct((N, C_OUT), x.dtype),
        grid_spec=pltpu.PrefetchScalarGridSpec(
            num_scalar_prefetch=0,
            grid=grid,
            in_specs=[
                pl.BlockSpec((tile_m, K), lambda i: (i, 0)),   # per-step varying
                pl.BlockSpec((K, C_OUT), lambda i: (0, 0)),    # resident weight
                pl.BlockSpec((3, C_OUT), lambda i: (0, 0)),    # resident params
            ],
            out_specs=pl.BlockSpec((tile_m, C_OUT), lambda i: (i, 0)),
        ),
        compiler_params=pltpu.CompilerParams(
            dimension_semantics=("parallel",)),
    )(patches, w_mat, params)

    return out.reshape(B, Hp * Wp, C_OUT)


def _reference(x, conv_w, conv_b, ln_gamma, ln_beta):
    """Pure-JAX reference mirroring the PyTorch forward."""
    y = jax.lax.conv_general_dilated(
        x, conv_w, window_strides=(PATCH, PATCH), padding="VALID",
        dimension_numbers=("NCHW", "OIHW", "NCHW"))
    y = y + conv_b[None, :, None, None]
    B, C, Hp, Wp = y.shape
    y = y.transpose(0, 2, 3, 1).reshape(B, Hp * Wp, C)      # b c h w -> b (h w) c
    mean = jnp.mean(y, axis=-1, keepdims=True)
    var = jnp.mean((y - mean) ** 2, axis=-1, keepdims=True)
    y = (y - mean) * jax.lax.rsqrt(var + LN_EPS) * ln_gamma + ln_beta
    return jnp.maximum(y, 0.0)


if __name__ == "__main__":
    key = jax.random.PRNGKey(0)
    k_x, k_w, k_b, k_g, k_bb = jax.random.split(key, 5)

    B, H, W = 2, 16, 16
    x = jax.random.normal(k_x, (B, 3, H, W), dtype=jnp.float32)

    # Deterministic synthetic parameters (Conv2d(3, 96, 4, 4) + LayerNorm(96))
    conv_w = 0.05 * jax.random.normal(k_w, (C_OUT, 3, PATCH, PATCH), dtype=jnp.float32)
    conv_b = 0.01 * jax.random.normal(k_b, (C_OUT,), dtype=jnp.float32)
    ln_gamma = 1.0 + 0.1 * jax.random.normal(k_g, (C_OUT,), dtype=jnp.float32)
    ln_beta = 0.1 * jax.random.normal(k_bb, (C_OUT,), dtype=jnp.float32)

    out = swin_embedding(x, conv_w, conv_b, ln_gamma, ln_beta)
    out = jax.block_until_ready(out)

    ref = _reference(x, conv_w, conv_b, ln_gamma, ln_beta)
    assert out.shape == (B, (H // PATCH) * (W // PATCH), C_OUT), out.shape
    assert jnp.allclose(out, ref, atol=1e-4, rtol=1e-4), float(jnp.max(jnp.abs(out - ref)))

    print("KERNEL_OK")
</pallas_src>

<mosaic_0001>
module attributes {stable_mosaic.version = 11 : i64} {
  func.func @_swin_embed_kernel(%arg0: i32, %arg1: memref<16x48xf32, #tpu.memory_space<vmem>>, %arg2: memref<48x96xf32, #tpu.memory_space<vmem>>, %arg3: memref<3x96xf32, #tpu.memory_space<vmem>>, %arg4: memref<16x96xf32, #tpu.memory_space<vmem>>) attributes {dimension_semantics = [#tpu.dimension_semantics<parallel>], iteration_bounds = array<i64: 2>, scalar_prefetch = 0 : i64, scratch_operands = 0 : i64, tpu.core_type = #tpu.core_type<tc>, window_params = [{transform_indices = @transform_0, window_bounds = array<i64: 16, 48>}, {pipeline_mode = #tpu.pipeline_mode<synchronous>, transform_indices = @transform_1, window_bounds = array<i64: 48, 96>}, {pipeline_mode = #tpu.pipeline_mode<synchronous>, transform_indices = @transform_2, window_bounds = array<i64: 3, 96>}, {transform_indices = @transform_3, window_bounds = array<i64: 16, 96>}]} {
    %c0 = arith.constant 0 : index
    %c0_0 = arith.constant 0 : index
    %0 = vector.load %arg1[%c0, %c0_0] : memref<16x48xf32, #tpu.memory_space<vmem>>, vector<16x48xf32>
    %c0_1 = arith.constant 0 : index
    %c0_2 = arith.constant 0 : index
    %1 = vector.load %arg2[%c0_1, %c0_2] : memref<48x96xf32, #tpu.memory_space<vmem>>, vector<48x96xf32>
    %cst = arith.constant dense<0.000000e+00> : vector<16x96xf32>
    %2 = tpu.matmul %0, %1, %cst {dimension_numbers = #tpu.dot_dimension_numbers<[1], [0], [0], [1], [0, 0, 1, 1], [], []>} : vector<16x48xf32>, vector<48x96xf32>, vector<16x96xf32> -> vector<16x96xf32>
    %c0_3 = arith.constant 0 : index
    %c0_4 = arith.constant 0 : index
    %3 = vector.load %arg3[%c0_3, %c0_4] : memref<3x96xf32, #tpu.memory_space<vmem>>, vector<1x96xf32>
    %4 = vector.broadcast %3 : vector<1x96xf32> to vector<16x96xf32>
    %5 = arith.addf %2, %4 : vector<16x96xf32>
    %cst_5 = arith.constant dense<0.000000e+00> : vector<16xf32>
    %6 = vector.multi_reduction <add>, %5, %cst_5 [1] : vector<16x96xf32> to vector<16xf32>
    %7 = vector.shape_cast %6 : vector<16xf32> to vector<16x1xf32>
    %cst_6 = arith.constant 9.600000e+01 : f32
    %8 = vector.broadcast %cst_6 : f32 to vector<16x1xf32>
    %9 = arith.divf %7, %8 : vector<16x1xf32>
    %10 = vector.broadcast %9 : vector<16x1xf32> to vector<16x96xf32>
    %11 = arith.subf %5, %10 : vector<16x96xf32>
    %12 = arith.mulf %11, %11 : vector<16x96xf32>
    %cst_7 = arith.constant dense<0.000000e+00> : vector<16xf32>
    %13 = vector.multi_reduction <add>, %12, %cst_7 [1] : vector<16x96xf32> to vector<16xf32>
    %14 = vector.shape_cast %13 : vector<16xf32> to vector<16x1xf32>
    %cst_8 = arith.constant 9.600000e+01 : f32
    %15 = vector.broadcast %cst_8 : f32 to vector<16x1xf32>
    %16 = arith.divf %14, %15 : vector<16x1xf32>
    %cst_9 = arith.constant 9.99999974E-6 : f32
    %17 = vector.broadcast %cst_9 : f32 to vector<16x1xf32>
    %18 = arith.addf %16, %17 : vector<16x1xf32>
    %19 = math.rsqrt %18 : vector<16x1xf32>
    %20 = vector.broadcast %19 : vector<16x1xf32> to vector<16x96xf32>
    %21 = arith.mulf %11, %20 : vector<16x96xf32>
    %c1 = arith.constant 1 : index
    %c0_10 = arith.constant 0 : index
    %22 = vector.load %arg3[%c1, %c0_10] : memref<3x96xf32, #tpu.memory_space<vmem>>, vector<1x96xf32>
    %23 = vector.broadcast %22 : vector<1x96xf32> to vector<16x96xf32>
    %24 = arith.mulf %21, %23 : vector<16x96xf32>
    %c2 = arith.constant 2 : index
    %c0_11 = arith.constant 0 : index
    %25 = vector.load %arg3[%c2, %c0_11] : memref<3x96xf32, #tpu.memory_space<vmem>>, vector<1x96xf32>
    %26 = vector.broadcast %25 : vector<1x96xf32> to vector<16x96xf32>
    %27 = arith.addf %24, %26 : vector<16x96xf32>
    %cst_12 = arith.constant 0.000000e+00 : f32
    %28 = vector.broadcast %cst_12 : f32 to vector<16x96xf32>
    %29 = arith.maximumf %27, %28 : vector<16x96xf32>
    %c0_13 = arith.constant 0 : index
    %c0_14 = arith.constant 0 : index
    %30 = vector.load %arg4[%c0_13, %c0_14] : memref<16x96xf32, #tpu.memory_space<vmem>>, vector<16x96xf32>
    tpu.vector_store %arg4[%c0_13, %c0_14], %29 {strides = array<i32>} : memref<16x96xf32, #tpu.memory_space<vmem>>, vector<16x96xf32>,
    return
  }
  func.func @transform_0(%arg0: i32) -> (i32, i32) {
    %c0_i32 = arith.constant 0 : i32
    %c0_i32_0 = arith.constant 0 : i32
    return %arg0, %c0_i32 : i32, i32
  }
  func.func @transform_1(%arg0: i32) -> (i32, i32) {
    %c0_i32 = arith.constant 0 : i32
    %c0_i32_0 = arith.constant 0 : i32
    %c0_i32_1 = arith.constant 0 : i32
    return %c0_i32, %c0_i32_0 : i32, i32
  }
  func.func @transform_2(%arg0: i32) -> (i32, i32) {
    %c0_i32 = arith.constant 0 : i32
    %c0_i32_0 = arith.constant 0 : i32
    %c0_i32_1 = arith.constant 0 : i32
    return %c0_i32, %c0_i32_0 : i32, i32
  }
  func.func @transform_3(%arg0: i32) -> (i32, i32) {
    %c0_i32 = arith.constant 0 : i32
    %c0_i32_0 = arith.constant 0 : i32
    return %arg0, %c0_i32 : i32, i32
  }
}

</mosaic_0001>

<bundles_post_ra>
// kernel: swin_embedding.1
= control target key start
LH: loop header
LB: loop body
LE: loop exit
PB: predicated region body
PF: predicated region fallthrough
CT: control target
= control target key end

     0   :  { %8 = vsyncpa [#allocation3], 0  ;;  %s630_s0 = inlined_call_operand.vmem [shape: f32[32,48], index: 0, kind: input, shape index: {}]   ;;  %s631_s1 = inlined_call_operand.vmem [shape: f32[48,96], index: 1, kind: input, shape index: {}]   ;;  %s632_s2 = inlined_call_operand.vmem [shape: f32[3,96], index: 2, kind: input, shape index: {}]   ;;  %s633_s3 = inlined_call_operand.hbm [shape: f32[32,96], index: 3, kind: output, shape index: {}]  }
   0x1   :  { %10 = vsyncpa [#allocation3 + $0x1], 0  ;;  %s513_s12 = smov 0   ;;  %s515_s13 = smov 0  }
   0x2   :  { %s517_s14 = smov 0   ;;  %s519_s15 = smov 0  }
   0x3 LB: > { %s534_s16 = sadd.s32 4294967295, %s488_s15   ;;  %s354_s17 = sadd.s32 4294967294, %s488_s15   ;;  %s488_s15 = sphi %s519_s15, %s639_s15   ;;  %s484_s14 = sphi %s517_s14, %s638_s14   ;;  %s480_s13 = sphi %s515_s13, %s637_s13   ;;  %s476_s12 = sphi %s513_s12, %s636_s12  }
   0x4   : > { %s538_s18 = sadd.s32 1, %s488_s15   ;;  %s91_s19 = sadd.s32 1, %s484_s14 }
   0x5   : > { %s88_s20 = ssub.s32 %s488_s15, %s538_s18  ;;  %p101_p0 = scmp.ne.s32.totalorder %s484_s14, %s480_s13 }
   0x6   : > { %p89_p1 = scmp.eq.s32.totalorder %s88_s20, 0  ;;  %p102_p2 = scmp.eq.s32.totalorder %s534_s16, 1 }
   0x7   : > { %p107_p3 = scmp.ne.s32.totalorder %s480_s13, %s476_s12  ;;  %p108_p4 = scmp.eq.s32.totalorder %s354_s17, 1 }
   0x8   : > { %s549_s21 = scalar_select %p89_p1, %s484_s14, %s91_s19  }
   0x9   : > { %p551_p5 = por %p102_p2, %p101_p0  ;;  %p555_p6 = por %p108_p4, %p107_p3 }
   0xa   : > { %p357_p7 = scmp.ge.s32.totalorder %s488_s15, 1  ;;  %p141_p8 = scmp.lt.s32.totalorder %s488_s15, 3 }
   0xc   : > { %p142_p9 = pnand %p357_p7, %p141_p8 }
   0xd   : > { %s359_s28 = sshll.u32 (!%p142_p9), %s534_s16, 1  ;;  %s162_s27 = sand.u32 (!%p142_p9), 1, %s480_s13  }
   0xe   : > { %145 = sbr.rel (%p142_p9) target bundleno = 441 (0x1b9), region = 32  ;;  %p166_p10 = scmp.lt.s32.totalorder (!%p142_p9), %s359_s28, 3 }
   0xf   : > { %s358_s30 = sshll.u32 (!%p142_p9), %s162_s27, 4  ;;  %s368_s4 = sshll.u32 (!%p142_p9), %s534_s16, 4 }
  0x10   : > { %s288_s7 = scalar_lea.hbm (!%p142_p9), %s633_s3, %s368_s4  ;;  %s164_s8 = scalar_lea.vmem (!%p142_p9), [#allocation2], %s358_s30 }
  0x11   : > { %s289_s9 = sshll.u32 (!%p142_p9), %s164_s8, 4  ;;  %s291_s10 = sshll.u32 (!%p142_p9), %s288_s7, 4  ;;  %s290_s9 = int_to_ptr.vmem [resolvable:$true] %s289_s9  ;;  %s292_s10 = int_to_ptr.hbm [resolvable:$true] %s291_s10 }
  0x12   : > { %s277_s16 = scalar_lea.sflag (!%p142_p9), [#allocation3], %s162_s27  ;;  %s446_s24 = scalar_lea.hbm (!%p142_p9), %s633_s3, 32 }
  0x13   : > { %v179_v0 = vld [vmem:[%s631_s1 + $0x28] sm:$0xff]  ;;  %v178_v1 = vld [vmem:[%s631_s1 + $0x20] sm:$0xff]  ;;  %v177_v2 = vld [vmem:[%s631_s1 + $0x18] sm:$0xff]  ;;  %s641_s28 = smov (!%p166_p10, %s359_s28), 3  ;;  %vm182_vm0 = vcmask 392192   ;;  %vm212_vm1 = vcmask 785408  }
  0x14   : > { %199 = vmatpush.msra.mxu0 %v179_v0  ;;  %369 = vmatpush.msra.mxu1 %v179_v0  ;;  %v176_v3 = vld [vmem:[%s631_s1 + $0x10] sm:$0xff]  ;;  %s360_s6 = sshll.u32 %s641_s28, 3  ;;  %v175_v4 = vld [vmem:[%s631_s1 + $0x8] sm:$0xff]  ;;  %v174_v5 = vld [vmem:[%s631_s1] sm:$0xff]  ;;  %v490_v15 = vmov 96.0  }
  0x15   : > { %s169_s11 = scalar_lea.vmem %s630_s0, %s360_s6  ;;  %v417_v8 = vld [vmem:[%s632_s2] ss:$0 sm:$0xff]  ;;  %420 = vrcp.f32 %v490_v15  ;;  %v418_v46 = vld [vmem:[%s632_s2 + $0x1] ss:$0 sm:$0xff]  ;;  %v419_v49 = vld [vmem:[%s632_s2 + $0x2] ss:$0 sm:$0xff] }
  0x16   : > { %200 = vmatpush.msra.mxu0 %v178_v1  ;;  %370 = vmatpush.msra.mxu1 %v178_v1  ;;  %v172_v6 = vld [vmem:[%s169_s11] sm:$0xff]  ;;  %v173_v7 = vld [vmem:[%s169_s11 + $0x8] sm:$0xff]  ;;  %s440_s11 = sshra.s32 %s292_s10, 4  ;;  %s441_s11 = int_to_ptr.hbm [resolvable:$true] %s440_s11 }
  0x17   : > { %s442_s17 = scalar_lea.hbm %s441_s11, 16  ;;  %p447_p0 = scmp.lt.s32.totalorder %s441_s11, %s633_s3 }
  0x18   : > { %201 = vmatpush.msra.mxu0 %v177_v2  ;;  %371 = vmatpush.msra.mxu1 %v177_v2  ;;  %p443_p11 = scmp.ne.s32.totalorder %s441_s11, %s442_s17  ;;  %p448_p1 = scmp.lt.s32.totalorder %s446_s24, %s442_s17 }
  0x1a   : > { %202 = vmatpush.msra.mxu0 %v176_v3  ;;  %372 = vmatpush.msra.mxu1 %v176_v3  ;;  %p444_p12 = pnand %p443_p11, %p551_p5  ;;  %p449_p2 = por %p448_p1, %p447_p0 }
  0x1b   : > { %v421_v16 = vpop.eup %420 }
  0x1c   : > { %203 = vmatpush.msra.mxu0 %v175_v4  ;;  %373 = vmatpush.msra.mxu1 %v175_v4  ;;  %v220_v17 = vmul.f32 96.0, %v421_v16  ;;  %vm224_vm2 = vweird.f32 %v421_v16  ;;  %p445_p13 = pneg %p444_p12 }
  0x1e   : > { %204 = vmatpush.msra.mxu0 %v174_v5  ;;  %374 = vmatpush.msra.mxu1 %v174_v5  ;;  %v221_v18 = vsub.f32 1.0, %v220_v17  ;;  %p450_p3 = pnand %p449_p2, %p445_p13 }
  0x1f   : > { %361 = vmatmul.msk.f32.vlgmr.msra.gmra.mxu0 %vm182_vm0, %v172_v6  ;;  %362 = vmatmul.msk.f32.vlgmr.msra.gmra.mxu1 %vm182_vm0, %v173_v7 }
  0x20   : > { %v222_v19 = vmul.f32 %v421_v16, %v221_v18 }
  0x22   : > { %v223_v20 = vadd.f32 %v421_v16, %v222_v19 }
  0x24   : > { %v225_v21 = vsel %vm224_vm2, %v421_v16, %v223_v20 }
  0x9c   : > { %v206_v9 = vpop.f32.mrf.mxu0  ;;  %v209_v11 = vpop.f32.mrf.mxu1 }
  0x9d   : > { %v207_v10 = vadd.f32 %v417_v8, %v206_v9  ;;  %v210_v13 = vadd.f32 %v417_v8, %v209_v11 }
  0x9f   : > { %v213_v12 = vsel %vm212_vm1, %v207_v10, 0.0  ;;  %v216_v14 = vsel %vm212_vm1, %v210_v13, 0.0 }
  0xa0   : > { %214 = vadd.xlane.f32.xlu0 %v213_v12 }
  0xa8   : > { %217 = vadd.xlane.f32.xlu0 %v216_v14 }
 0x113   : > { %v215_v22 = vpop.xlane.xlu0 %214 }
 0x114   : > { %v226_v23 = vmul.f32 %v225_v21, %v215_v22 }
 0x116   : > { %v228_v24 = vsub.f32 %v207_v10, %v226_v23 }
 0x118   : > { %v230_v25 = vmul.f32 %v228_v24, %v228_v24 }
 0x11a   : > { %v232_v26 = vsel %vm212_vm1, %v230_v25, 0.0 }
 0x11b   : > { %233 = vadd.xlane.f32.xlu1 %v232_v26  ;;  %v218_v27 = vpop.xlane.xlu0 %217 }
 0x11c   : > { %v227_v28 = vmul.f32 %v225_v21, %v218_v27 }
 0x11e   : > { %v229_v29 = vsub.f32 %v210_v13, %v227_v28 }
 0x120   : > { %v231_v30 = vmul.f32 %v229_v29, %v229_v29 }
 0x122   : > { %v235_v31 = vsel %vm212_vm1, %v231_v30, 0.0 }
 0x123   : > { %236 = vadd.xlane.f32.xlu1 %v235_v31 }
 0x18e   : > { %v234_v32 = vpop.xlane.xlu1 %233 }
 0x18f   : > { %v238_v33 = vmul.f32 %v234_v32, %v225_v21 }
 0x191   : > { %v240_v34 = vadd.f32 1e-05, %v238_v33 }
 0x193   : > { %422 = vrsqrt.f32 %v240_v34  ;;  %vm248_vm4 = vweird.f32 %v240_v34 }
 0x196   : > { %v237_v35 = vpop.xlane.xlu1 %236 }
 0x197   : > { %v239_v36 = vmul.f32 %v237_v35, %v225_v21 }
 0x199   : > { %v423_v37 = vpop.eup %422  ;;  %v241_v38 = vadd.f32 1e-05, %v239_v36 }
 0x19a   : > { %v243_v39 = vmul.f32 %v423_v37, %v240_v34  ;;  %vm249_vm3 = vweird.f32 %v423_v37 }
 0x19b   : > { %424 = vrsqrt.f32 %v241_v38  ;;  %vm250_vm5 = vmor %vm248_vm4, %vm249_vm3  ;;  %vm258_vm7 = vweird.f32 %v241_v38 }
 0x19c   : > { %v244_v40 = vmul.f32 %v423_v37, %v243_v39 }
 0x19e   : > { %v245_v41 = vmul.f32 0.5, %v244_v40 }
 0x1a0   : > { %v246_v42 = vsub.f32 1.5, %v245_v41 }
 0x1a1   : > { %v425_v43 = vpop.eup %424 }
 0x1a2   : > { %v247_v44 = vmul.f32 %v423_v37, %v246_v42  ;;  %v253_v45 = vmul.f32 %v425_v43, %v241_v38  ;;  %vm259_vm6 = vweird.f32 %v425_v43 }
 0x1a3   : > { %vm260_vm8 = vmor %vm258_vm7, %vm259_vm6 }
 0x1a4   : > { %v251_v47 = vsel %vm250_vm5, %v423_v37, %v247_v44  ;;  %v254_v48 = vmul.f32 %v425_v43, %v253_v45 }
 0x1a5   : > { %v262_v50 = vmul.f32 %v251_v47, %v228_v24 }
 0x1a6   : > { %v255_v51 = vmul.f32 0.5, %v254_v48 }
 0x1a7   : > { %v266_v52 = vmul.f32 %v418_v46, %v262_v50 }
 0x1a8   : > { %v256_v53 = vsub.f32 1.5, %v255_v51 }
 0x1a9   : > { %v270_v54 = vadd.f32 %v419_v49, %v266_v52 }
 0x1aa   : > { %v257_v55 = vmul.f32 %v425_v43, %v256_v53 }
 0x1ab   : > { %v272_v56 = vmax.f32 %v270_v54, 0.0 }
 0x1ac   : > { %v261_v57 = vsel %vm260_vm8, %v425_v43, %v257_v55 }
 0x1ad   : > { %v263_v58 = vmul.f32 %v261_v57, %v229_v29  ;;  %274 = vst.msk [vmem:[%s164_s8] sm:$0xff] %vm212_vm1, %v272_v56 }
 0x1af   : > { %v267_v59 = vmul.f32 %v418_v46, %v263_v58 }
 0x1b1   : > { %v271_v60 = vadd.f32 %v419_v49, %v267_v59 }
 0x1b3   : > { %v273_v61 = vmax.f32 %v271_v60, 0.0 }
 0x1b5   : > { %275 = vst.msk [vmem:[%s164_s8 + $0x8] sm:$0xff] %vm212_vm1, %v273_v61 }
 0x1b6   : > { %453 = shalt.err (!%p450_p3)
}
 0x1b7   : > { %s491_s27 = smov 128   ;;  %s492_s28 = smov 8  }
 0x1b8   : > { %375 = dma.vmem_to_hbm [thread:$0]  (%p551_p5), %s290_s9, 256, %s292_s10, %s277_s16, %s491_s27, %s491_s27, %s492_s28  }
 0x1b9 PF: > { %p381_p4 = scmp.ge.s32.totalorder %s488_s15, 2  ;;  %s306_s29 = sand.u32 1, %s476_s12  }
 0x1ba   : > { %s307_s30 = scalar_lea.sflag [#allocation3], %s306_s29 }
 0x1bb   : > { %p378_p7 = pnand %p381_p4, %p555_p6 }
 0x1bd   : > { %p379_p8 = pneg %p378_p7 }
 0x1bf   : > { %471 = dma.done.wait (%p379_p8), %s307_s30, 256  }
 0x1c0   : > { %473 = vsyncadd (%p379_p8), %s307_s30, 4294967040  ;;  %p13_p9 = scmp.ge.s32.totalorder %s538_s18, 4   ;;  %s636_s12 = smov %s480_s13 }
 0x1c1   : > { %s637_s13 = smov %s484_s14  ;;  %s638_s14 = smov %s549_s21 }
 0x1c2   : > { %s639_s15 = smov %s538_s18  ;;  %15 = sbr.rel (!%p13_p9) target bundleno = 3 (0x3), region = 67 }
 0x1c7   :  { %313 = vsyncpa [#allocation3], 1 }
 0x1c8   :  { %315 = vsyncpa [#allocation3 + $0x1], 1 }

</bundles_post_ra>
